<compile_context>
chip_gen: v7x
topology: tpu7x:2x2x1
jax: 0.10.0
libtpu: 0.0.40
codegen_flags: <defaults>
</compile_context>

<pallas_src>
import functools
import math

import jax
import jax.numpy as jnp
from jax import lax
from jax.experimental import pallas as pl
from jax.experimental.pallas import tpu as pltpu


def _round_up(x, m):
    return (x + m - 1) // m * m


def _softmax_times_v(scores, v, seq_len, s_pad):
    """f32 softmax over the key axis (masking padded keys) followed by P@V."""
    if s_pad != seq_len:  # static check: no-op when the sequence is unpadded
        key_idx = lax.broadcasted_iota(jnp.int32, scores.shape, 1)
        scores = jnp.where(key_idx < seq_len, scores, -jnp.inf)
    m = jnp.max(scores, axis=-1, keepdims=True)
    p = jnp.exp(scores - m)
    l = jnp.sum(p, axis=-1, keepdims=True)
    # EUP approx reciprocal + one Newton step -> ~f32 accuracy, no VALU divide.
    r = pl.reciprocal(l, approx=True)
    r = r * (2.0 - l * r)
    ctx = jnp.dot(p.astype(v.dtype), v, preferred_element_type=jnp.float32)
    return ctx * r


def _attn_single_tile_kernel(x_ref, wqkv_ref, o_ref, *, seq_len):
    """Whole sequence in one tile: a single fused QKV matmul + attention.

    x_ref:    (S_pad, E_pad)    padded input
    wqkv_ref: (E_pad, 3*D_pad)  fused padded weight [W_Q*scale | W_K | W_V]
    o_ref:    (S_pad, D_pad)    padded output
    """
    _, d_pad = o_ref.shape
    s_pad = x_ref.shape[0]

    qkv = jnp.dot(x_ref[...], wqkv_ref[...], preferred_element_type=jnp.float32)
    q = qkv[:, :d_pad]
    k = qkv[:, d_pad:2 * d_pad]
    v = qkv[:, 2 * d_pad:]

    # Q @ K^T as a transposed contraction (MXU consumes K as-is, no k.T).
    scores = lax.dot_general(
        q, k, (((1,), (1,)), ((), ())), preferred_element_type=jnp.float32)

    o_ref[...] = _softmax_times_v(scores, v, seq_len, s_pad).astype(o_ref.dtype)


def _attn_tiled_kernel(x_ref, wqkv_ref, o_ref, kv_ref, *, seq_len):
    """Query-tiled attention; K|V projected once into VMEM scratch at i == 0.

    x_ref:    (S_pad, E_pad)     full padded input, resident every grid step
    wqkv_ref: (E_pad, 3*D_pad)   fused padded weight [W_Q*scale | W_K | W_V]
    o_ref:    (TQ, D_pad)        this grid step's query tile of the output
    kv_ref:   (S_pad, 2*D_pad)   f32 scratch: [K | V] for the whole sequence
    """
    tq, d_pad = o_ref.shape
    s_pad = x_ref.shape[0]
    i = pl.program_id(0)

    @pl.when(i == 0)
    def _():
        # One fused K|V projection, cached in VMEM and reused by every tile.
        kv_ref[...] = jnp.dot(
            x_ref[...], wqkv_ref[:, d_pad:], preferred_element_type=jnp.float32)

    # Q only for this tile.
    start = pl.multiple_of(i * tq, tq)
    x_q = x_ref[pl.ds(start, tq), :]
    q = jnp.dot(x_q, wqkv_ref[:, :d_pad], preferred_element_type=jnp.float32)

    k = kv_ref[:, :d_pad]
    v = kv_ref[:, d_pad:]

    scores = lax.dot_general(
        q, k, (((1,), (1,)), ((), ())), preferred_element_type=jnp.float32)

    o_ref[...] = _softmax_times_v(scores, v, seq_len, s_pad).astype(o_ref.dtype)


def self_attention_v1(inputs, w_q, w_k, w_v, *, block_q=256):
    """Pallas implementation of SelfAttention_v1.forward.

    inputs:        (seq_length, embedding_dim)
    w_q, w_k, w_v: (embedding_dim, output_dim)
    returns:       (seq_length, output_dim), dtype = inputs.dtype
    """
    s, e = inputs.shape
    d = w_v.shape[1]

    # Lane-dense padding: last dims to multiples of 128, seq to a sublane/tile
    # multiple. Zero padding keeps the math exact; we slice the result back.
    e_pad = _round_up(e, 128)
    d_pad = _round_up(d, 128)
    s_pad = _round_up(s, 8)
    tq = min(block_q, s_pad)
    s_pad = _round_up(s_pad, tq)
    grid = (s_pad // tq,)
    single_tile = grid[0] == 1

    scale = 1.0 / math.sqrt(d)  # module divides scores by sqrt(value_dim)

    # Fused, padded weight: [W_Q * scale | W_K | W_V].
    w_qkv = jnp.zeros((e_pad, 3 * d_pad), dtype=w_q.dtype)
    w_qkv = w_qkv.at[:e, 0 * d_pad:0 * d_pad + d].set(w_q * scale)
    w_qkv = w_qkv.at[:e, 1 * d_pad:1 * d_pad + d].set(w_k)
    w_qkv = w_qkv.at[:e, 2 * d_pad:2 * d_pad + d].set(w_v)

    x_pad = jnp.zeros((s_pad, e_pad), dtype=inputs.dtype).at[:s, :e].set(inputs)

    # Advisory cost hint so XLA schedules around the custom call sensibly.
    flops = 2 * s * e * 3 * d + 2 * 2 * s * s * d
    bytes_accessed = 4 * (s_pad * e_pad + e_pad * 3 * d_pad + s_pad * d_pad)

    if single_tile:
        kernel = functools.partial(_attn_single_tile_kernel, seq_len=s)
        scratch_shapes = []
    else:
        kernel = functools.partial(_attn_tiled_kernel, seq_len=s)
        scratch_shapes = [pltpu.VMEM((s_pad, 2 * d_pad), jnp.float32)]

    out = pl.pallas_call(
        kernel,
        out_shape=jax.ShapeDtypeStruct((s_pad, d_pad), inputs.dtype),
        grid_spec=pltpu.PrefetchScalarGridSpec(
            num_scalar_prefetch=0,
            grid=grid,
            in_specs=[
                pl.BlockSpec((s_pad, e_pad), lambda i: (0, 0)),       # x (resident)
                pl.BlockSpec((e_pad, 3 * d_pad), lambda i: (0, 0)),   # fused W_QKV
            ],
            out_specs=pl.BlockSpec((tq, d_pad), lambda i: (i, 0)),
            scratch_shapes=scratch_shapes,
        ),
        compiler_params=pltpu.CompilerParams(
            # "arbitrary": the K|V scratch (multi-tile case) is carried across
            # query-tile iterations, so the axis must run in order.
            dimension_semantics=("arbitrary",),
        ),
        cost_estimate=pl.CostEstimate(
            flops=flops, transcendentals=s * s, bytes_accessed=bytes_accessed),
    )(x_pad, w_qkv)

    return out[:s, :d]


def _reference(inputs, w_q, w_k, w_v):
    q = inputs @ w_q
    k = inputs @ w_k
    v = inputs @ w_v
    scores = q @ k.T / jnp.sqrt(jnp.float32(v.shape[-1]))
    attn = jax.nn.softmax(scores, axis=-1)
    return attn @ v


if __name__ == "__main__":
    seq_len = 8
    embedding_dim = 32
    output_dim = 16

    key = jax.random.PRNGKey(0)
    k_x, k_q, k_k, k_v, k_x2 = jax.random.split(key, 5)

    # Deterministic "torch.randn"-style parameter init.
    x = jax.random.normal(k_x, (seq_len, embedding_dim), dtype=jnp.float32)
    w_q = jax.random.normal(k_q, (embedding_dim, output_dim), dtype=jnp.float32)
    w_k = jax.random.normal(k_k, (embedding_dim, output_dim), dtype=jnp.float32)
    w_v = jax.random.normal(k_v, (embedding_dim, output_dim), dtype=jnp.float32)

    # Primary check at the module's natural small shape (single-tile path).
    out = jax.block_until_ready(self_attention_v1(x, w_q, w_k, w_v))
    ref = _reference(x, w_q, w_k, w_v)
    assert out.shape == (seq_len, output_dim)
    assert jnp.allclose(out, ref, atol=1e-3, rtol=1e-3), (
        float(jnp.max(jnp.abs(out - ref))))

    # Secondary check exercising the tiled path (padded keys + cached K|V).
    seq2 = 40
    x2 = jax.random.normal(k_x2, (seq2, embedding_dim), dtype=jnp.float32)
    out2 = jax.block_until_ready(self_attention_v1(x2, w_q, w_k, w_v, block_q=16))
    ref2 = _reference(x2, w_q, w_k, w_v)
    assert out2.shape == (seq2, output_dim)
    assert jnp.allclose(out2, ref2, atol=2e-3, rtol=2e-3), (
        float(jnp.max(jnp.abs(out2 - ref2))))

    print("KERNEL_OK")
</pallas_src>

<mosaic_0001>
module attributes {stable_mosaic.version = 11 : i64} {
  func.func @_attn_single_tile_kernel(%arg0: i32, %arg1: memref<8x128xf32, #tpu.memory_space<vmem>>, %arg2: memref<128x384xf32, #tpu.memory_space<vmem>>, %arg3: memref<8x128xf32, #tpu.memory_space<vmem>>) attributes {dimension_semantics = [#tpu.dimension_semantics<arbitrary>], iteration_bounds = array<i64: 1>, scalar_prefetch = 0 : i64, scratch_operands = 0 : i64, tpu.core_type = #tpu.core_type<tc>, window_params = [{pipeline_mode = #tpu.pipeline_mode<synchronous>, transform_indices = @transform_0, window_bounds = array<i64: 8, 128>}, {pipeline_mode = #tpu.pipeline_mode<synchronous>, transform_indices = @transform_1, window_bounds = array<i64: 128, 384>}, {transform_indices = @transform_2, window_bounds = array<i64: 8, 128>}]} {
    %c0 = arith.constant 0 : index
    %c0_0 = arith.constant 0 : index
    %0 = vector.load %arg1[%c0, %c0_0] : memref<8x128xf32, #tpu.memory_space<vmem>>, vector<8x128xf32>
    %c0_1 = arith.constant 0 : index
    %c0_2 = arith.constant 0 : index
    %1 = vector.load %arg2[%c0_1, %c0_2] : memref<128x384xf32, #tpu.memory_space<vmem>>, vector<128x384xf32>
    %cst = arith.constant dense<0.000000e+00> : vector<8x384xf32>
    %2 = tpu.matmul %0, %1, %cst {dimension_numbers = #tpu.dot_dimension_numbers<[1], [0], [0], [1], [0, 0, 1, 1], [], []>} : vector<8x128xf32>, vector<128x384xf32>, vector<8x384xf32> -> vector<8x384xf32>
    %3 = vector.extract_strided_slice %2 {offsets = [0, 0], sizes = [8, 128], strides = [1, 1]} : vector<8x384xf32> to vector<8x128xf32>
    %4 = vector.extract_strided_slice %2 {offsets = [0, 128], sizes = [8, 128], strides = [1, 1]} : vector<8x384xf32> to vector<8x128xf32>
    %5 = vector.extract_strided_slice %2 {offsets = [0, 256], sizes = [8, 128], strides = [1, 1]} : vector<8x384xf32> to vector<8x128xf32>
    %cst_3 = arith.constant dense<0.000000e+00> : vector<8x8xf32>
    %6 = tpu.matmul %3, %4, %cst_3 {dimension_numbers = #tpu.dot_dimension_numbers<[1], [1], [0], [0], [0, 0, 1, 0], [], []>} : vector<8x128xf32>, vector<8x128xf32>, vector<8x8xf32> -> vector<8x8xf32>
    %cst_4 = arith.constant dense<0xFF800000> : vector<8xf32>
    %7 = vector.multi_reduction <maximumf>, %6, %cst_4 [1] : vector<8x8xf32> to vector<8xf32>
    %8 = vector.shape_cast %7 : vector<8xf32> to vector<8x1xf32>
    %9 = vector.broadcast %8 : vector<8x1xf32> to vector<8x8xf32>
    %10 = arith.subf %6, %9 : vector<8x8xf32>
    %11 = math.exp %10 : vector<8x8xf32>
    %cst_5 = arith.constant dense<0.000000e+00> : vector<8xf32>
    %12 = vector.multi_reduction <add>, %11, %cst_5 [1] : vector<8x8xf32> to vector<8xf32>
    %13 = vector.shape_cast %12 : vector<8xf32> to vector<8x1xf32>
    %14 = tpu.reciprocal %13 {approx = true} : vector<8x1xf32> -> vector<8x1xf32>
    %15 = arith.mulf %13, %14 : vector<8x1xf32>
    %cst_6 = arith.constant 2.000000e+00 : f32
    %16 = vector.broadcast %cst_6 : f32 to vector<8x1xf32>
    %17 = arith.subf %16, %15 : vector<8x1xf32>
    %18 = arith.mulf %14, %17 : vector<8x1xf32>
    %cst_7 = arith.constant dense<0.000000e+00> : vector<8x128xf32>
    %19 = tpu.matmul %11, %5, %cst_7 {dimension_numbers = #tpu.dot_dimension_numbers<[1], [0], [0], [1], [0, 0, 1, 1], [], []>} : vector<8x8xf32>, vector<8x128xf32>, vector<8x128xf32> -> vector<8x128xf32>
    %20 = vector.broadcast %18 : vector<8x1xf32> to vector<8x128xf32>
    %21 = arith.mulf %19, %20 : vector<8x128xf32>
    %c0_8 = arith.constant 0 : index
    %c0_9 = arith.constant 0 : index
    %22 = vector.load %arg3[%c0_8, %c0_9] : memref<8x128xf32, #tpu.memory_space<vmem>>, vector<8x128xf32>
    tpu.vector_store %arg3[%c0_8, %c0_9], %21 {strides = array<i32>} : memref<8x128xf32, #tpu.memory_space<vmem>>, vector<8x128xf32>,
    return
  }
  func.func @transform_0(%arg0: i32) -> (i32, i32) {
    %c0_i32 = arith.constant 0 : i32
    %c0_i32_0 = arith.constant 0 : i32
    %c0_i32_1 = arith.constant 0 : i32
    return %c0_i32, %c0_i32_0 : i32, i32
  }
  func.func @transform_1(%arg0: i32) -> (i32, i32) {
    %c0_i32 = arith.constant 0 : i32
    %c0_i32_0 = arith.constant 0 : i32
    %c0_i32_1 = arith.constant 0 : i32
    return %c0_i32, %c0_i32_0 : i32, i32
  }
  func.func @transform_2(%arg0: i32) -> (i32, i32) {
    %c0_i32 = arith.constant 0 : i32
    %c0_i32_0 = arith.constant 0 : i32
    return %arg0, %c0_i32 : i32, i32
  }
}

</mosaic_0001>

<bundles_post_ra>
// kernel: tpu_custom_call.1
= control target key start
LH: loop header
LB: loop body
LE: loop exit
PB: predicated region body
PF: predicated region fallthrough
CT: control target
= control target key end

     0   :  { %7 = vsyncpa [#allocation3], 0  ;;  %s685_s0 = inlined_call_operand.hbm [shape: f32[8,128], index: 0, kind: input, shape index: {}]   ;;  %s686_s1 = inlined_call_operand.hbm [shape: f32[128,384], index: 1, kind: input, shape index: {}]   ;;  %s687_s2 = inlined_call_operand.hbm [shape: f32[8,128], index: 2, kind: output, shape index: {}]  }
   0x1   :  { %8 = vsyncpa [#allocation6], 0 }
   0x2   :  { %9 = vsyncpa [#allocation4], 0  ;;  %s610_s9 = smov [#allocation2]   ;;  %s611_s11 = smov [#allocation5]  }
   0x3   :  { %s16_s10 = sshll.u32 %s610_s9, 4  ;;  %s25_s12 = sshll.u32 %s611_s11, 4  ;;  %s17_s10 = int_to_ptr.vmem [resolvable:$true] %s16_s10  ;;  %s633_s12 = int_to_ptr.vmem [resolvable:$true] %s25_s12 }
   0x4   :  { %s538_s15 = scalar_lea.hbm %s685_s0, 128 }
   0x5   :  { %p539_p0 = scmp.ne.s32.totalorder %s685_s0, %s538_s15  ;;  %p542_p1 = scmp.lt.u32.totalorder %s538_s15, %s685_s0 }
   0x7   :  { %p544_p2 = pnand %p542_p1, %p539_p0 }
   0x9   :  { %547 = shalt.err (!%p544_p2)
}
   0xa   :  { %s548_s20 = scalar_lea.vmem %s17_s10, 128  ;;  %p553_p4 = scmp.lt.s32.totalorder %s17_s10, %s17_s10 }
   0xb   :  { %p549_p3 = scmp.ne.s32.totalorder %s17_s10, %s548_s20  ;;  %p554_p5 = scmp.lt.s32.totalorder %s548_s20, %s548_s20 }
   0xd   :  { %p555_p6 = por %p554_p5, %p553_p4 }
   0xf   :  { %p556_p7 = pnand %p555_p6, %p549_p3 }
  0x11   :  { %559 = shalt.err (!%p556_p7)
}
  0x12   :  { %19 = dma.hbm_to_vmem [thread:$0]  %s685_s0, 128, %s17_s10, [#allocation3]  }
  0x13   :  { %s560_s25 = scalar_lea.hbm %s686_s1, 6144 }
  0x14   :  { %p561_p8 = scmp.ne.s32.totalorder %s686_s1, %s560_s25  ;;  %p564_p9 = scmp.lt.u32.totalorder %s560_s25, %s686_s1 }
  0x16   :  { %p566_p10 = pnand %p564_p9, %p561_p8 }
  0x18   :  { %569 = shalt.err (!%p566_p10)
}
  0x19   :  { %s570_s30 = scalar_lea.vmem %s633_s12, 6144  ;;  %p575_p12 = scmp.lt.s32.totalorder %s633_s12, %s633_s12 }
  0x1a   :  { %p571_p11 = scmp.ne.s32.totalorder %s633_s12, %s570_s30  ;;  %p576_p13 = scmp.lt.s32.totalorder %s570_s30, %s570_s30 }
  0x1c   :  { %p577_p0 = por %p576_p13, %p575_p12 }
  0x1e   :  { %p578_p1 = pnand %p577_p0, %p571_p11 }
  0x20   :  { %581 = shalt.err (!%p578_p1)
}
  0x21   :  { %s612_s0 = smov 384   ;;  %s613_s3 = smov 24  }
  0x22   :  { %31 = dma.hbm_to_vmem [thread:$0]  %s686_s1, 6144, %s633_s12, [#allocation6], %s612_s0, %s612_s0, %s613_s3  }
  0x23   :  { %604 = dma.done.wait [#allocation3], 128  }
  0x24   :  { %605 = vsyncadd [#allocation3], 4294967168 }
  0x25   :  { %606 = dma.done.wait [#allocation6], 6144  }
  0x26   :  { %607 = vsyncadd [#allocation6], 4294961152  ;;  %v614_v0 = vmov 0.0   ;;  %v40_v1 = vld [vmem:[#allocation5 + $0x8] sm:$0xff]  ;;  %v43_v2 = vld [vmem:[#allocation5 + $0x20] sm:$0xff]  ;;  %vm615_vm0 = vmmov 0  }
  0x27   :  { %151 = vmatprep.mubr.f32.mxu0 %v614_v0  ;;  %v39_v3 = vld [vmem:[#allocation5] sm:$0xff]  ;;  %v470_v4 = vpack.c.bf16 %v43_v2, %v40_v1  ;;  %v42_v5 = vld [vmem:[#allocation5 + $0x18] sm:$0xff]  ;;  %v49_v7 = vld [vmem:[#allocation5 + $0x50] sm:$0xff]  ;;  %457 = vmatprep.mubr.msk.f32.mxu1 %vm615_vm0, %v614_v0  ;;  %v616_v53 = vmov 0.0|0.0   ;;  %vm298_vm1 = vcmask 64512   ;;  %s617_s1 = smov [#allocation7]  }
  0x28   :  { %v46_v6 = vld [vmem:[#allocation5 + $0x38] sm:$0xff]  ;;  %v472_v8 = vpack.c.bf16 %v42_v5, %v39_v3  ;;  %v45_v10 = vld [vmem:[#allocation5 + $0x30] sm:$0xff]  ;;  %v48_v11 = vld [vmem:[#allocation5 + $0x48] sm:$0xff]  ;;  %502 = vmatprep.subr.bf16.mxu1 %v616_v53  ;;  %s393_s6 = sshll.u32 %s617_s1, 4  ;;  %s394_s6 = int_to_ptr.vmem [resolvable:$true] %s393_s6 }
  0x29   :  { %v474_v9 = vpack.c.bf16 %v49_v7, %v46_v6  ;;  %v52_v12 = vld [vmem:[#allocation5 + $0x68] sm:$0xff]  ;;  %471 = vmatprep.subr.bf16.mxu0 %v470_v4  ;;  %v55_v13 = vld [vmem:[#allocation5 + $0x80] sm:$0xff]  ;;  %v476_v14 = vpack.c.bf16 %v48_v11, %v45_v10  ;;  %v54_v17 = vld [vmem:[#allocation5 + $0x78] sm:$0xff]  ;;  %s582_s7 = scalar_lea.vmem %s394_s6, 128  ;;  %p587_p3 = scmp.lt.s32.totalorder %s394_s6, %s394_s6 }
  0x2a   :  { %473 = vmatpush1.bf16.msra.mxu0 %v472_v8  ;;  %v478_v15 = vpack.c.bf16 %v55_v13, %v52_v12  ;;  %v51_v16 = vld [vmem:[#allocation5 + $0x60] sm:$0xff]  ;;  %v58_v18 = vld [vmem:[#allocation5 + $0x98] sm:$0xff]  ;;  %v61_v19 = vld [vmem:[#allocation5 + $0xb0] sm:$0xff]  ;;  %p583_p2 = scmp.ne.s32.totalorder %s394_s6, %s582_s7  ;;  %p588_p4 = scmp.lt.s32.totalorder %s582_s7, %s582_s7 }
  0x2b   :  { %475 = vmatprep.subr.bf16.mxu0 %v474_v9  ;;  %v480_v20 = vpack.c.bf16 %v54_v17, %v51_v16  ;;  %v482_v21 = vpack.c.bf16 %v61_v19, %v58_v18  ;;  %v57_v22 = vld [vmem:[#allocation5 + $0x90] sm:$0xff]  ;;  %v60_v23 = vld [vmem:[#allocation5 + $0xa8] sm:$0xff]  ;;  %v67_v25 = vld [vmem:[#allocation5 + $0xe0] sm:$0xff] }
  0x2c   :  { %v64_v24 = vld [vmem:[#allocation5 + $0xc8] sm:$0xff]  ;;  %v484_v26 = vpack.c.bf16 %v60_v23, %v57_v22  ;;  %v63_v28 = vld [vmem:[#allocation5 + $0xc0] sm:$0xff]  ;;  %v66_v29 = vld [vmem:[#allocation5 + $0xd8] sm:$0xff]  ;;  %p589_p5 = por %p588_p4, %p587_p3 }
  0x2d   :  { %v486_v27 = vpack.c.bf16 %v67_v25, %v64_v24  ;;  %v70_v30 = vld [vmem:[#allocation5 + $0xf8] sm:$0xff]  ;;  %v73_v31 = vld [vmem:[#allocation5 + $0x110] sm:$0xff]  ;;  %v488_v32 = vpack.c.bf16 %v66_v29, %v63_v28  ;;  %v72_v35 = vld [vmem:[#allocation5 + $0x108] sm:$0xff] }
  0x2e   :  { %477 = vmatpush1.bf16.msra.mxu0 %v476_v14  ;;  %v490_v33 = vpack.c.bf16 %v73_v31, %v70_v30  ;;  %v69_v34 = vld [vmem:[#allocation5 + $0xf0] sm:$0xff]  ;;  %v76_v36 = vld [vmem:[#allocation5 + $0x128] sm:$0xff]  ;;  %v79_v37 = vld [vmem:[#allocation5 + $0x140] sm:$0xff]  ;;  %p590_p6 = pnand %p589_p5, %p583_p2 }
  0x2f   :  { %479 = vmatprep.subr.bf16.mxu0 %v478_v15  ;;  %v492_v38 = vpack.c.bf16 %v72_v35, %v69_v34  ;;  %v494_v39 = vpack.c.bf16 %v79_v37, %v76_v36  ;;  %v75_v40 = vld [vmem:[#allocation5 + $0x120] sm:$0xff]  ;;  %v78_v41 = vld [vmem:[#allocation5 + $0x138] sm:$0xff]  ;;  %v85_v43 = vld [vmem:[#allocation5 + $0x170] sm:$0xff] }
  0x30   :  { %v82_v42 = vld [vmem:[#allocation5 + $0x158] sm:$0xff]  ;;  %v496_v44 = vpack.c.bf16 %v78_v41, %v75_v40  ;;  %v81_v46 = vld [vmem:[#allocation5 + $0x150] sm:$0xff]  ;;  %v84_v47 = vld [vmem:[#allocation5 + $0x168] sm:$0xff] }
  0x31   :  { %v498_v45 = vpack.c.bf16 %v85_v43, %v82_v42  ;;  %v500_v48 = vpack.c.bf16 %v84_v47, %v81_v46  ;;  %v38_v49 = vld [vmem:[#allocation2] sm:$0xff]  ;;  %v41_v50 = vld [vmem:[#allocation5 + $0x10] sm:$0xff]  ;;  %v44_v51 = vld [vmem:[#allocation5 + $0x28] sm:$0xff] }
  0x32   :  { %481 = vmatpush1.bf16.msra.mxu0 %v480_v20  ;;  %v47_v52 = vld [vmem:[#allocation5 + $0x40] sm:$0xff]  ;;  %v503_v54 = vpack.c.bf16 %v44_v51, %v41_v50  ;;  %v50_v55 = vld [vmem:[#allocation5 + $0x58] sm:$0xff]  ;;  %v53_v57 = vld [vmem:[#allocation5 + $0x70] sm:$0xff] }
  0x33   :  { %483 = vmatprep.subr.bf16.mxu0 %v482_v21  ;;  %v506_v56 = vpack.c.bf16 %v50_v55, %v47_v52  ;;  %v56_v58 = vld [vmem:[#allocation5 + $0x88] sm:$0xff]  ;;  %v59_v60 = vld [vmem:[#allocation5 + $0xa0] sm:$0xff]  ;;  %v62_v61 = vld [vmem:[#allocation5 + $0xb8] sm:$0xff] }
  0x34   :  { %504 = vmatpush3.bf16.msra.mxu1 %v503_v54  ;;  %v509_v59 = vpack.c.bf16 %v56_v58, %v53_v57  ;;  %v512_v62 = vpack.c.bf16 %v62_v61, %v59_v60  ;;  %v65_v63 = vld [vmem:[#allocation5 + $0xd0] sm:$0xff]  ;;  %v68_v1 = vld [vmem:[#allocation5 + $0xe8] sm:$0xff]  ;;  %v71_v3 = vld [vmem:[#allocation5 + $0x100] sm:$0xff] }
  0x35   :  { %505 = vmatprep.subr.bf16.mxu1 %v616_v53  ;;  %v515_v2 = vpack.c.bf16 %v68_v1, %v65_v63  ;;  %v74_v4 = vld [vmem:[#allocation5 + $0x118] sm:$0xff]  ;;  %v77_v6 = vld [vmem:[#allocation5 + $0x130] sm:$0xff]  ;;  %v80_v7 = vld [vmem:[#allocation5 + $0x148] sm:$0xff] }
  0x36   :  { %485 = vmatpush1.bf16.msra.mxu0 %v484_v26  ;;  %v518_v5 = vpack.c.bf16 %v74_v4, %v71_v3  ;;  %v521_v8 = vpack.c.bf16 %v80_v7, %v77_v6  ;;  %v83_v9 = vld [vmem:[#allocation5 + $0x160] sm:$0xff]  ;;  %v86_v10 = vld [vmem:[#allocation5 + $0x178] sm:$0xff] }
  0x37   :  { %487 = vmatprep.subr.bf16.mxu0 %v486_v27  ;;  %v524_v11 = vpack.c.bf16 %v86_v10, %v83_v9 }
  0x38   :  { %507 = vmatpush3.bf16.msra.mxu1 %v506_v56 }
  0x39   :  { %508 = vmatprep.subr.bf16.mxu1 %v616_v53 }
  0x3a   :  { %489 = vmatpush1.bf16.msra.mxu0 %v488_v32 }
  0x3b   :  { %491 = vmatprep.subr.bf16.mxu0 %v490_v33 }
  0x3c   :  { %510 = vmatpush3.bf16.msra.mxu1 %v509_v59 }
  0x3d   :  { %511 = vmatprep.subr.bf16.mxu1 %v616_v53 }
  0x3e   :  { %493 = vmatpush1.bf16.msra.mxu0 %v492_v38 }
  0x3f   :  { %495 = vmatprep.subr.bf16.mxu0 %v494_v39 }
  0x40   :  { %513 = vmatpush3.bf16.msra.mxu1 %v512_v62 }
  0x41   :  { %514 = vmatprep.subr.bf16.mxu1 %v616_v53 }
  0x42   :  { %497 = vmatpush1.bf16.msra.mxu0 %v496_v44 }
  0x43   :  { %499 = vmatprep.subr.bf16.mxu0 %v498_v45 }
  0x44   :  { %516 = vmatpush3.bf16.msra.mxu1 %v515_v2 }
  0x45   :  { %517 = vmatprep.subr.bf16.mxu1 %v616_v53 }
  0x46   :  { %501 = vmatpush1.bf16.msra.mxu0 %v500_v48 }
  0x47   :  { %460 = vmatprep.subr.mxu0 %v614_v0 }
  0x48   :  { %519 = vmatpush3.bf16.msra.mxu1 %v518_v5 }
  0x49   :  { %152 = vmatmul.mubr.f32.vlgmr.msra.gmra.mrb[0].mxu0 %v38_v49  ;;  %520 = vmatprep.subr.bf16.mxu1 %v616_v53 }
  0x4a   :  { %462 = vmatprep.mubr.msk.f32.mxu0 %vm615_vm0, %v614_v0 }
  0x4c   :  { %522 = vmatpush3.bf16.msra.mxu1 %v521_v8 }
  0x4d   :  { %523 = vmatprep.subr.bf16.mxu1 %v616_v53 }
  0x50   :  { %525 = vmatpush3.bf16.msra.mxu1 %v524_v11 }
  0x51   :  { %465 = vmatprep.subr.mxu1 %v614_v0 }
  0x53   :  { %458 = vmatmul.mubr.f32.vlgmr.msra.gmra.mrb[0].mxu1 %v38_v49 }
  0x54   :  { %467 = vmatprep.mubr.msk.f32.mxu1 %vm615_vm0, %v614_v0 }
 0x11c   :  { %v153_v12 = vpop.f32.mrb[0].mxu0 }
 0x11d   :  { %v155_v13 = vpop.f32.mrb[1].mxu0 }
 0x11e   :  { %461 = vmatpush3.xpose.msra.mxu0 %v155_v13 }
 0x121   :  { %463 = vmatmul.mubr.f32.vlgmr.msra.gmra.mrb[2].mxu0 %v153_v12 }
 0x126   :  { %v224_v17 = vpop.f32.mrb[0].mxu1 }
 0x127   :  { %v459_v18 = vpop.f32.mrb[1].mxu1  ;;  %466 = vmatpush3.msra.mxu1 %v224_v17 }
 0x1f4   :  { %v294_v14 = vpop.f32.mrb[2].mxu0 }
 0x1f5   :  { %v464_v15 = vpop.f32.mrb[3].mxu0  ;;  %v299_v16 = vsel %vm298_vm1, %v294_v14, -inf }
 0x1f6   :  { %300 = vmax.xlane.f32.xlu0 %v299_v16 }
 0x283   :  { %v301_v19 = vpop.xlane.xlu0 %300 }
 0x284   :  { %v302_v20 = vsub.f32 %v294_v14, %v301_v19 }
 0x286   :  { %v303_v21 = vmul.f32 1.442695, %v302_v20 }
 0x288   :  { %534 = vpow2.f32 %v303_v21 }
 0x292   :  { %v535_v22 = vpop.eup %534 }
 0x293   :  { %468 = vmatmul.mubr.msk.f32.vlgmr.msra.gmra.mrb[2].mxu1 %vm298_vm1, %v535_v22  ;;  %v305_v23 = vsel %vm298_vm1, %v535_v22, 0.0 }
 0x294   :  { %306 = vadd.xlane.f32.xlu0 %v305_v23 }
 0x321   :  { %v307_v0 = vpop.xlane.xlu0 %306 }
 0x322   :  { %536 = vrcp.f32 %v307_v0 }
 0x32c   :  { %v537_v24 = vpop.eup %536 }
 0x32d   :  { %v309_v25 = vmul.f32 %v537_v24, %v307_v0 }
 0x32f   :  { %v310_v26 = vsub.f32 2.0, %v309_v25 }
 0x331   :  { %v311_v27 = vmul.f32 %v537_v24, %v310_v26 }
 0x366   :  { %v381_v28 = vpop.f32.mrb[2].mxu1 }
 0x367   :  { %v385_v29 = vmul.f32 %v381_v28, %v311_v27  ;;  %v469_v30 = vpop.f32.mrb[3].mxu1 }
 0x369   :  { %386 = vst [vmem:[#allocation7] sm:$0xff] %v385_v29 }
 0x36a   :  { %593 = shalt.err (!%p590_p6)
}
 0x36b   :  { %s594_s10 = scalar_lea.hbm %s687_s2, 128 }
 0x36c   :  { %p595_p7 = scmp.ne.s32.totalorder %s687_s2, %s594_s10  ;;  %p598_p8 = scmp.lt.u32.totalorder %s594_s10, %s687_s2 }
 0x36e   :  { %p600_p9 = pnand %p598_p8, %p595_p7 }
 0x370   :  { %603 = shalt.err (!%p600_p9)
}
 0x371   :  { %396 = dma.vmem_to_hbm [thread:$0]  %s394_s6, 128, %s687_s2, [#allocation4]  }
 0x372   :  { %608 = dma.done.wait [#allocation4], 128  }
 0x373   :  { %609 = vsyncadd [#allocation4], 4294967168 }
 0x374   :  { %400 = vsyncpa [#allocation3], 1 }
 0x375   :  { %401 = vsyncpa [#allocation6], 1 }
 0x376   :  { %402 = vsyncpa [#allocation4], 1 }

</bundles_post_ra>
